<compile_context>
chip_gen: v6e
topology: v6e:2x2x1
jax: 0.10.0
libtpu: 0.0.40
codegen_flags: <defaults>
</compile_context>

<pallas_src>
import functools

import jax
import jax.numpy as jnp
from jax.experimental import pallas as pl
from jax.experimental.pallas import tpu as pltpu


# ---------------------------------------------------------------------------
# Pallas kernels
# ---------------------------------------------------------------------------
def _gemm_stats_kernel(a_ref, b_ref, y_ref, sum_ref, sq_ref):
    """y = a @ b (bf16 in, f32 acc) + fused per-tile column sum / sum-of-squares."""
    acc = jnp.dot(a_ref[...], b_ref[...], preferred_element_type=jnp.float32)
    y_ref[...] = acc.astype(y_ref.dtype)
    cs = jnp.sum(acc, axis=0, keepdims=True)            # (1, C)
    cq = jnp.sum(acc * acc, axis=0, keepdims=True)      # (1, C)
    sum_ref[...] = jnp.broadcast_to(cs, sum_ref.shape)  # (8, C), rows replicated
    sq_ref[...] = jnp.broadcast_to(cq, sq_ref.shape)


def _bn_act_kernel(y_ref, s_ref, t_ref, o_ref, *, slope):
    z = y_ref[...].astype(jnp.float32) * s_ref[...] + t_ref[...]
    o_ref[...] = jnp.where(z >= 0, z, slope * z).astype(o_ref.dtype)


# ---------------------------------------------------------------------------
# Pallas wrappers
# ---------------------------------------------------------------------------
def _select_tm(m, k, bytes_per_elt=2, budget=8 << 20):
    """Row tile for the full-K single-pass GEMM, capped by a VMEM budget."""
    cap = max(8, ((budget // (2 * k * bytes_per_elt)) // 8) * 8)
    tm = min(512, cap)
    if m <= tm:
        if m >= 128 and m % 16 == 0:
            return m // 2          # expose 2 parallel row blocks (dual-TC chips)
        return m                   # single full-row block (legal for any M)
    if m <= 2 * tm and m % 16 == 0:
        return m // 2
    return tm


def pallas_gemm_with_colstats(a_bf16, b_bf16, out_dtype=jnp.bfloat16):
    """(M,K)@(K,C) with f32 accumulation; also returns per-column sum / sumsq."""
    m, k = a_bf16.shape
    k2, c = b_bf16.shape
    assert k == k2
    tm = _select_tm(m, k)
    mp = ((m + tm - 1) // tm) * tm
    if mp != m:                     # zero rows -> contribute nothing to BN sums
        a_bf16 = jnp.pad(a_bf16, ((0, mp - m), (0, 0)))
    nmt = mp // tm

    y, ssum, ssq = pl.pallas_call(
        _gemm_stats_kernel,
        out_shape=(jax.ShapeDtypeStruct((mp, c), out_dtype),
                   jax.ShapeDtypeStruct((nmt * 8, c), jnp.float32),
                   jax.ShapeDtypeStruct((nmt * 8, c), jnp.float32)),
        grid=(nmt,),
        in_specs=(pl.BlockSpec((tm, k), lambda i: (i, 0)),
                  pl.BlockSpec((k, c), lambda i: (0, 0))),
        out_specs=(pl.BlockSpec((tm, c), lambda i: (i, 0)),
                   pl.BlockSpec((8, c), lambda i: (i, 0)),
                   pl.BlockSpec((8, c), lambda i: (i, 0))),
        compiler_params=pltpu.CompilerParams(
            dimension_semantics=("parallel",)),
    )(a_bf16, b_bf16)

    colsum = ssum.reshape(nmt, 8, c)[:, 0, :].sum(axis=0)
    colsumsq = ssq.reshape(nmt, 8, c)[:, 0, :].sum(axis=0)
    return y, colsum, colsumsq, tm


def pallas_bn_leaky(y2d, scale_row, shift_row, tm, slope=0.2,
                    out_dtype=jnp.float32):
    """Per-column affine (BN scale/shift) + LeakyReLU over a (M, C) slab."""
    mp, c = y2d.shape
    # Larger elementwise tiles: take the whole slab when it fits comfortably.
    if mp * c * (y2d.dtype.itemsize + 4) <= (8 << 20):
        tma = mp
    else:
        tma = tm                     # divides mp by construction
    return pl.pallas_call(
        functools.partial(_bn_act_kernel, slope=slope),
        out_shape=jax.ShapeDtypeStruct((mp, c), out_dtype),
        grid=(mp // tma,),
        in_specs=(pl.BlockSpec((tma, c), lambda i: (i, 0)),
                  pl.BlockSpec((1, c), lambda i: (0, 0)),
                  pl.BlockSpec((1, c), lambda i: (0, 0))),
        out_specs=pl.BlockSpec((tma, c), lambda i: (i, 0)),
        compiler_params=pltpu.CompilerParams(
            dimension_semantics=("parallel",)),
    )(y2d, scale_row, shift_row)


# ---------------------------------------------------------------------------
# Sub-pixel ConvTranspose2d decomposition (JAX glue builds only non-zero taps)
# ---------------------------------------------------------------------------
def _axis_meta(r, k, s, p, n_in, n_out):
    """Metadata for one spatial axis and output residue r (output index % s)."""
    q = (n_out - r + s - 1) // s if r < n_out else 0      # residue output size
    rho = (r + p) % s
    t = (k - 1 - rho) // s + 1 if rho < k else 0           # contributing taps
    delta = (r + p) // s
    off = delta - t + 1
    lpad = max(0, -off)
    start = off + lpad
    rpad = max(0, (q - 1 + delta) - (n_in - 1)) if q > 0 else 0
    taps = [(t - 1 - j) * s + rho for j in range(t)]        # original kernel idx
    return q, t, start, lpad, rpad, taps


def conv_trans_forward(x, weight, gamma, beta, *, stride, padding, outpadding,
                       eps=1e-5, slope=0.2):
    """ConvTranspose2d(bias=False) + BatchNorm2d (batch stats) + LeakyReLU."""
    n, cin, h, w = x.shape
    cin_w, cout, kh, kw = weight.shape
    assert cin == cin_w
    s, p, op = stride, padding, outpadding
    hout = (h - 1) * s - 2 * p + kh + op
    wout = (w - 1) * s - 2 * p + kw + op

    x_bf = x.astype(jnp.bfloat16)
    w_bf = weight.astype(jnp.bfloat16)

    col_sum = jnp.zeros((cout,), jnp.float32)
    col_sq = jnp.zeros((cout,), jnp.float32)
    pieces = []
    for rh in range(s):
        qh, th, sh, lh, rhp, taps_h = _axis_meta(rh, kh, s, p, h, hout)
        for rw in range(s):
            qw, tw, sw, lw, rwp, taps_w = _axis_meta(rw, kw, s, p, w, wout)
            if qh == 0 or qw == 0:
                continue
            m = n * qh * qw
            if th == 0 or tw == 0:          # no kernel tap hits this residue
                pieces.append((rh, rw, qh, qw, m, None))
                continue
            xp = jnp.pad(x_bf, ((0, 0), (0, 0), (lh, rhp), (lw, rwp)))
            cols = [xp[:, :, sh + a:sh + a + qh, sw + b:sw + b + qw]
                    for a in range(th) for b in range(tw)]
            patches = jnp.stack(cols, axis=2)               # (N,Cin,Th*Tw,Qh,Qw)
            a_mat = patches.transpose(0, 3, 4, 1, 2).reshape(m, cin * th * tw)
            wsub = w_bf[:, :, jnp.array(taps_h), :][:, :, :, jnp.array(taps_w)]
            b_mat = wsub.transpose(0, 2, 3, 1).reshape(cin * th * tw, cout)
            y, cs, cq, tm = pallas_gemm_with_colstats(a_mat, b_mat)
            col_sum = col_sum + cs
            col_sq = col_sq + cq
            pieces.append((rh, rw, qh, qw, m, (y, tm)))

    # BatchNorm batch statistics (biased variance, training-mode semantics),
    # assembled from the fused per-tile sums (y is never re-read for stats).
    m_tot = n * hout * wout
    mean = col_sum / m_tot
    var = jnp.maximum(col_sq / m_tot - mean * mean, 0.0)
    inv = jax.lax.rsqrt(var + eps)
    scale = gamma.astype(jnp.float32) * inv
    shift = beta.astype(jnp.float32) - mean * scale
    # TODO(synk): running_mean/running_var momentum updates are training-state
    # bookkeeping only and are not modelled (forward output is unaffected).

    scale_row = scale.reshape(1, cout)
    shift_row = shift.reshape(1, cout)
    out = jnp.zeros((n, cout, hout, wout), jnp.float32)
    for rh, rw, qh, qw, m, payload in pieces:
        if payload is None:                 # conv output is exactly zero here
            z = jnp.broadcast_to(shift, (n, qh, qw, cout))
            z = jnp.where(z >= 0, z, slope * z)
        else:
            y, tm = payload
            z = pallas_bn_leaky(y, scale_row, shift_row, tm, slope=slope)[:m]
            z = z.reshape(n, qh, qw, cout)
        out = out.at[:, :, rh::s, rw::s].set(z.transpose(0, 3, 1, 2))
    return out


# ---------------------------------------------------------------------------
# Pure-JAX reference (correctness check only)
# ---------------------------------------------------------------------------
def ref_conv_trans(x, w, gamma, beta, stride, padding, outpadding,
                   eps=1e-5, slope=0.2):
    kh, kw = w.shape[2], w.shape[3]
    w_conv = jnp.transpose(w[:, :, ::-1, ::-1], (1, 0, 2, 3))   # (Cout,Cin,kh,kw)
    y = jax.lax.conv_general_dilated(
        x, w_conv, window_strides=(1, 1),
        padding=[(kh - 1 - padding, kh - 1 - padding + outpadding),
                 (kw - 1 - padding, kw - 1 - padding + outpadding)],
        lhs_dilation=(stride, stride), rhs_dilation=(1, 1),
        dimension_numbers=("NCHW", "OIHW", "NCHW"),
        precision=jax.lax.Precision.HIGHEST)
    mean = jnp.mean(y, axis=(0, 2, 3), keepdims=True)
    var = jnp.mean((y - mean) ** 2, axis=(0, 2, 3), keepdims=True)
    z = (y - mean) / jnp.sqrt(var + eps)
    z = z * gamma[None, :, None, None] + beta[None, :, None, None]
    return jnp.where(z >= 0, z, slope * z)


# ---------------------------------------------------------------------------
def _run_case(key, n, cin, cout, ksz, stride, padding, outpadding, hw):
    kx, kw_, kg, kb = jax.random.split(key, 4)
    x = jax.random.normal(kx, (n, cin, hw, hw), jnp.float32)
    # PyTorch ConvTranspose2d weight layout: (Cin, Cout, kH, kW)
    w = jax.random.normal(kw_, (cin, cout, ksz, ksz), jnp.float32) * 0.05
    gamma = jax.random.uniform(kg, (cout,), jnp.float32, 0.5, 1.5)
    beta = jax.random.normal(kb, (cout,), jnp.float32) * 0.1

    fwd = jax.jit(functools.partial(conv_trans_forward, stride=stride,
                                    padding=padding, outpadding=outpadding))
    out = fwd(x, w, gamma, beta)
    jax.block_until_ready(out)

    hout = (hw - 1) * stride - 2 * padding + ksz + outpadding
    assert out.shape == (n, cout, hout, hout), out.shape
    assert bool(jnp.all(jnp.isfinite(out)))
    ref = ref_conv_trans(x, w, gamma, beta, stride, padding, outpadding)
    err = float(jnp.max(jnp.abs(out - ref)))
    # bf16 MXU inputs + bf16 intermediate slab vs. full-f32 reference.
    assert jnp.allclose(out, ref, atol=3e-2, rtol=3e-2), err
    return err


if __name__ == "__main__":
    key = jax.random.PRNGKey(0)
    k1, k2 = jax.random.split(key)
    # Classic DCGAN 2x-upsampling block: ConvTrans(64, 32, 4, 2, 1, 0)
    _run_case(k1, n=2, cin=64, cout=32, ksz=4, stride=2, padding=1,
              outpadding=0, hw=8)
    # Kernel not divisible by stride + output_padding: ConvTrans(32, 16, 5, 3, 1, 1)
    _run_case(k2, n=2, cin=32, cout=16, ksz=5, stride=3, padding=1,
              outpadding=1, hw=5)
    print("KERNEL_OK")
</pallas_src>

<mosaic_0001>
module attributes {stable_mosaic.version = 11 : i64} {
  func.func @_gemm_stats_kernel(%arg0: i32, %arg1: memref<64x256xbf16, #tpu.memory_space<vmem>>, %arg2: memref<256x32xbf16, #tpu.memory_space<vmem>>, %arg3: memref<64x32xbf16, #tpu.memory_space<vmem>>, %arg4: memref<8x32xf32, #tpu.memory_space<vmem>>, %arg5: memref<8x32xf32, #tpu.memory_space<vmem>>) attributes {dimension_semantics = [#tpu.dimension_semantics<parallel>], iteration_bounds = array<i64: 2>, scalar_prefetch = 0 : i64, scratch_operands = 0 : i64, tpu.core_type = #tpu.core_type<tc>, window_params = [{transform_indices = @transform_0, window_bounds = array<i64: 64, 256>}, {pipeline_mode = #tpu.pipeline_mode<synchronous>, transform_indices = @transform_1, window_bounds = array<i64: 256, 32>}, {transform_indices = @transform_2, window_bounds = array<i64: 64, 32>}, {transform_indices = @transform_3, window_bounds = array<i64: 8, 32>}, {transform_indices = @transform_4, window_bounds = array<i64: 8, 32>}]} {
    %c0 = arith.constant 0 : index
    %c0_0 = arith.constant 0 : index
    %0 = vector.load %arg1[%c0, %c0_0] : memref<64x256xbf16, #tpu.memory_space<vmem>>, vector<64x256xbf16>
    %c0_1 = arith.constant 0 : index
    %c0_2 = arith.constant 0 : index
    %1 = vector.load %arg2[%c0_1, %c0_2] : memref<256x32xbf16, #tpu.memory_space<vmem>>, vector<256x32xbf16>
    %cst = arith.constant dense<0.000000e+00> : vector<64x32xf32>
    %2 = tpu.matmul %0, %1, %cst {dimension_numbers = #tpu.dot_dimension_numbers<[1], [0], [0], [1], [0, 0, 1, 1], [], []>} : vector<64x256xbf16>, vector<256x32xbf16>, vector<64x32xf32> -> vector<64x32xf32>
    %3 = arith.truncf %2 : vector<64x32xf32> to vector<64x32xbf16>
    %c0_3 = arith.constant 0 : index
    %c0_4 = arith.constant 0 : index
    %4 = vector.load %arg3[%c0_3, %c0_4] : memref<64x32xbf16, #tpu.memory_space<vmem>>, vector<64x32xbf16>
    tpu.vector_store %arg3[%c0_3, %c0_4], %3 {strides = array<i32>} : memref<64x32xbf16, #tpu.memory_space<vmem>>, vector<64x32xbf16>,
    %cst_5 = arith.constant dense<0.000000e+00> : vector<32xf32>
    %5 = vector.multi_reduction <add>, %2, %cst_5 [0] : vector<64x32xf32> to vector<32xf32>
    %6 = vector.shape_cast %5 : vector<32xf32> to vector<1x32xf32>
    %7 = arith.mulf %2, %2 : vector<64x32xf32>
    %cst_6 = arith.constant dense<0.000000e+00> : vector<32xf32>
    %8 = vector.multi_reduction <add>, %7, %cst_6 [0] : vector<64x32xf32> to vector<32xf32>
    %9 = vector.shape_cast %8 : vector<32xf32> to vector<1x32xf32>
    %10 = vector.shape_cast %6 : vector<1x32xf32> to vector<1x32xf32>
    %11 = vector.broadcast %10 : vector<1x32xf32> to vector<8x32xf32>
    %c0_7 = arith.constant 0 : index
    %c0_8 = arith.constant 0 : index
    %12 = vector.load %arg4[%c0_7, %c0_8] : memref<8x32xf32, #tpu.memory_space<vmem>>, vector<8x32xf32>
    tpu.vector_store %arg4[%c0_7, %c0_8], %11 {strides = array<i32>} : memref<8x32xf32, #tpu.memory_space<vmem>>, vector<8x32xf32>,
    %13 = vector.shape_cast %9 : vector<1x32xf32> to vector<1x32xf32>
    %14 = vector.broadcast %13 : vector<1x32xf32> to vector<8x32xf32>
    %c0_9 = arith.constant 0 : index
    %c0_10 = arith.constant 0 : index
    %15 = vector.load %arg5[%c0_9, %c0_10] : memref<8x32xf32, #tpu.memory_space<vmem>>, vector<8x32xf32>
    tpu.vector_store %arg5[%c0_9, %c0_10], %14 {strides = array<i32>} : memref<8x32xf32, #tpu.memory_space<vmem>>, vector<8x32xf32>,
    return
  }
  func.func @transform_0(%arg0: i32) -> (i32, i32) {
    %c0_i32 = arith.constant 0 : i32
    %c0_i32_0 = arith.constant 0 : i32
    return %arg0, %c0_i32 : i32, i32
  }
  func.func @transform_1(%arg0: i32) -> (i32, i32) {
    %c0_i32 = arith.constant 0 : i32
    %c0_i32_0 = arith.constant 0 : i32
    %c0_i32_1 = arith.constant 0 : i32
    return %c0_i32, %c0_i32_0 : i32, i32
  }
  func.func @transform_2(%arg0: i32) -> (i32, i32) {
    %c0_i32 = arith.constant 0 : i32
    %c0_i32_0 = arith.constant 0 : i32
    return %arg0, %c0_i32 : i32, i32
  }
  func.func @transform_3(%arg0: i32) -> (i32, i32) {
    %c0_i32 = arith.constant 0 : i32
    %c0_i32_0 = arith.constant 0 : i32
    return %arg0, %c0_i32 : i32, i32
  }
  func.func @transform_4(%arg0: i32) -> (i32, i32) {
    %c0_i32 = arith.constant 0 : i32
    %c0_i32_0 = arith.constant 0 : i32
    return %arg0, %c0_i32 : i32, i32
  }
}

module attributes {stable_mosaic.version = 11 : i64} {
  func.func @_bn_act_kernel(%arg0: i32, %arg1: memref<128x32xbf16, #tpu.memory_space<vmem>>, %arg2: memref<1x32xf32, #tpu.memory_space<vmem>>, %arg3: memref<1x32xf32, #tpu.memory_space<vmem>>, %arg4: memref<128x32xf32, #tpu.memory_space<vmem>>) attributes {dimension_semantics = [#tpu.dimension_semantics<parallel>], iteration_bounds = array<i64: 1>, scalar_prefetch = 0 : i64, scratch_operands = 0 : i64, tpu.core_type = #tpu.core_type<tc>, window_params = [{transform_indices = @transform_0, window_bounds = array<i64: 128, 32>}, {pipeline_mode = #tpu.pipeline_mode<synchronous>, transform_indices = @transform_1, window_bounds = array<i64: 1, 32>}, {pipeline_mode = #tpu.pipeline_mode<synchronous>, transform_indices = @transform_2, window_bounds = array<i64: 1, 32>}, {transform_indices = @transform_3, window_bounds = array<i64: 128, 32>}]} {
    %c0 = arith.constant 0 : index
    %c0_0 = arith.constant 0 : index
    %0 = vector.load %arg1[%c0, %c0_0] : memref<128x32xbf16, #tpu.memory_space<vmem>>, vector<128x32xbf16>
    %1 = arith.extf %0 : vector<128x32xbf16> to vector<128x32xf32>
    %c0_1 = arith.constant 0 : index
    %c0_2 = arith.constant 0 : index
    %2 = vector.load %arg2[%c0_1, %c0_2] : memref<1x32xf32, #tpu.memory_space<vmem>>, vector<1x32xf32>
    %3 = vector.broadcast %2 : vector<1x32xf32> to vector<128x32xf32>
    %4 = arith.mulf %1, %3 : vector<128x32xf32>
    %c0_3 = arith.constant 0 : index
    %c0_4 = arith.constant 0 : index
    %5 = vector.load %arg3[%c0_3, %c0_4] : memref<1x32xf32, #tpu.memory_space<vmem>>, vector<1x32xf32>
    %6 = vector.broadcast %5 : vector<1x32xf32> to vector<128x32xf32>
    %7 = arith.addf %4, %6 : vector<128x32xf32>
    %cst = arith.constant 0.000000e+00 : f32
    %8 = vector.broadcast %cst : f32 to vector<128x32xf32>
    %9 = arith.cmpf oge, %7, %8 : vector<128x32xf32>
    %cst_5 = arith.constant 2.000000e-01 : f32
    %10 = vector.broadcast %cst_5 : f32 to vector<128x32xf32>
    %11 = arith.mulf %10, %7 : vector<128x32xf32>
    %12 = arith.select %9, %7, %11 : vector<128x32xi1>, vector<128x32xf32>
    %c0_6 = arith.constant 0 : index
    %c0_7 = arith.constant 0 : index
    %13 = vector.load %arg4[%c0_6, %c0_7] : memref<128x32xf32, #tpu.memory_space<vmem>>, vector<128x32xf32>
    tpu.vector_store %arg4[%c0_6, %c0_7], %12 {strides = array<i32>} : memref<128x32xf32, #tpu.memory_space<vmem>>, vector<128x32xf32>,
    return
  }
  func.func @transform_0(%arg0: i32) -> (i32, i32) {
    %c0_i32 = arith.constant 0 : i32
    %c0_i32_0 = arith.constant 0 : i32
    return %arg0, %c0_i32 : i32, i32
  }
  func.func @transform_1(%arg0: i32) -> (i32, i32) {
    %c0_i32 = arith.constant 0 : i32
    %c0_i32_0 = arith.constant 0 : i32
    %c0_i32_1 = arith.constant 0 : i32
    return %c0_i32, %c0_i32_0 : i32, i32
  }
  func.func @transform_2(%arg0: i32) -> (i32, i32) {
    %c0_i32 = arith.constant 0 : i32
    %c0_i32_0 = arith.constant 0 : i32
    %c0_i32_1 = arith.constant 0 : i32
    return %c0_i32, %c0_i32_0 : i32, i32
  }
  func.func @transform_3(%arg0: i32) -> (i32, i32) {
    %c0_i32 = arith.constant 0 : i32
    %c0_i32_0 = arith.constant 0 : i32
    return %arg0, %c0_i32 : i32, i32
  }
}

</mosaic_0001>

<bundles_post_ra>
// kernel: conv_trans_forward.15
= control target key start
LH: loop header
LB: loop body
LE: loop exit
PB: predicated region body
PF: predicated region fallthrough
CT: control target
= control target key end

     0   :  { %vm140_vm0 = vcmask 261120   ;;  %s352_s0 = inlined_call_operand.vmem [shape: bf16[128,32], index: 0, kind: input, shape index: {}]   ;;  %s353_s1 = inlined_call_operand.vmem [shape: f32[1,32], index: 1, kind: input, shape index: {}]   ;;  %s354_s2 = inlined_call_operand.vmem [shape: f32[1,32], index: 2, kind: input, shape index: {}]   ;;  %s355_s3 = inlined_call_operand.vmem [shape: f32[128,32], index: 3, kind: output, shape index: {}]  }
   0x1   :  { %v164_v0 = vld [vmem:[%s352_s0] sm:$0xff]   ;;  %v195_v4 = vld [vmem:[%s352_s0 + $0x8] sm:$0xff]   ;;  %v196_v5 = vld [vmem:[%s352_s0 + $0x10] sm:$0xff]  }
   0x2   :  { %v228_v1 = vld [vmem:[%s353_s1] ss:$0 sm:$0xff]  ;;  %v165_v2 = vunpack.c.l.bf16 %v164_v0  ;;  %v166_v3 = vunpack.c.h.bf16 %v164_v0  ;;  %v197_v6 = vld [vmem:[%s352_s0 + $0x18] sm:$0xff]   ;;  %v169_v8 = vunpack.c.l.bf16 %v195_v4  ;;  %v170_v9 = vunpack.c.h.bf16 %v195_v4  ;;  %v199_v36 = vld [vmem:[%s352_s0 + $0x28] sm:$0xff]  }
   0x3   :  { %v242_v7 = vld [vmem:[%s354_s2] ss:$0 sm:$0xff]  ;;  %v173_v10 = vunpack.c.l.bf16 %v196_v5  ;;  %v174_v11 = vunpack.c.h.bf16 %v196_v5  ;;  %v177_v14 = vunpack.c.l.bf16 %v197_v6  ;;  %v178_v15 = vunpack.c.h.bf16 %v197_v6  ;;  %v200_v48 = vld [vmem:[%s352_s0 + $0x30] sm:$0xff]   ;;  %v201_v55 = vld [vmem:[%s352_s0 + $0x38] sm:$0xff]  }
   0x4   :  { %v53_v12 = vmul.f32 %v165_v2, %v228_v1  ;;  %v54_v13 = vmul.f32 %v166_v3, %v228_v1  ;;  %v55_v16 = vmul.f32 %v169_v8, %v228_v1  ;;  %v56_v17 = vmul.f32 %v170_v9, %v228_v1  ;;  %v198_v28 = vld [vmem:[%s352_s0 + $0x20] sm:$0xff]  }
   0x5   :  { %v57_v18 = vmul.f32 %v173_v10, %v228_v1  ;;  %v58_v19 = vmul.f32 %v174_v11, %v228_v1  ;;  %v59_v22 = vmul.f32 %v177_v14, %v228_v1  ;;  %v60_v23 = vmul.f32 %v178_v15, %v228_v1 }
   0x6   :  { %v76_v20 = vadd.f32 %v242_v7, %v53_v12  ;;  %v77_v21 = vadd.f32 %v242_v7, %v54_v13  ;;  %v78_v24 = vadd.f32 %v242_v7, %v55_v16  ;;  %v79_v25 = vadd.f32 %v242_v7, %v56_v17 }
   0x7   :  { %v80_v26 = vadd.f32 %v242_v7, %v57_v18  ;;  %v81_v27 = vadd.f32 %v242_v7, %v58_v19  ;;  %v82_v41 = vadd.f32 %v242_v7, %v59_v22  ;;  %v83_v42 = vadd.f32 %v242_v7, %v60_v23 }
   0x8   :  { %vm92_vm1 = vcmp.ge.f32.partialorder %v76_v20, 0.0  ;;  %v108_v29 = vmul.f32 0.2, %v76_v20  ;;  %vm93_vm2 = vcmp.ge.f32.partialorder %v77_v21, 0.0  ;;  %v109_v30 = vmul.f32 0.2, %v77_v21 }
   0x9   :  { %vm94_vm3 = vcmp.ge.f32.partialorder %v78_v24, 0.0  ;;  %v110_v31 = vmul.f32 0.2, %v78_v24  ;;  %vm95_vm4 = vcmp.ge.f32.partialorder %v79_v25, 0.0  ;;  %v111_v32 = vmul.f32 0.2, %v79_v25 }
   0xa   :  { %v124_v33 = vsel %vm92_vm1, %v76_v20, %v108_v29  ;;  %v125_v34 = vsel %vm93_vm2, %v77_v21, %v109_v30  ;;  %vm96_vm5 = vcmp.ge.f32.partialorder %v80_v26, 0.0  ;;  %v112_v35 = vmul.f32 0.2, %v80_v26 }
   0xb   :  { %141 = vst.msk [vmem:[%s355_s3] sm:$0xff] %vm140_vm0, %v124_v33  ;;  %142 = vst.msk [vmem:[%s355_s3 + $0x8] sm:$0xff] %vm140_vm0, %v125_v34  ;;  %v126_v37 = vsel %vm94_vm3, %v78_v24, %v110_v31  ;;  %v127_v38 = vsel %vm95_vm4, %v79_v25, %v111_v32  ;;  %vm97_vm6 = vcmp.ge.f32.partialorder %v81_v27, 0.0  ;;  %v113_v39 = vmul.f32 0.2, %v81_v27 }
   0xc   :  { %143 = vst.msk [vmem:[%s355_s3 + $0x10] sm:$0xff] %vm140_vm0, %v126_v37  ;;  %144 = vst.msk [vmem:[%s355_s3 + $0x18] sm:$0xff] %vm140_vm0, %v127_v38  ;;  %v128_v40 = vsel %vm96_vm5, %v80_v26, %v112_v35  ;;  %v181_v43 = vunpack.c.l.bf16 %v198_v28  ;;  %v182_v45 = vunpack.c.h.bf16 %v198_v28  ;;  %v185_v46 = vunpack.c.l.bf16 %v199_v36 }
   0xd   :  { %145 = vst.msk [vmem:[%s355_s3 + $0x20] sm:$0xff] %vm140_vm0, %v128_v40  ;;  %v129_v44 = vsel %vm97_vm6, %v81_v27, %v113_v39  ;;  %v186_v47 = vunpack.c.h.bf16 %v199_v36  ;;  %vm98_vm7 = vcmp.ge.f32.partialorder %v82_v41, 0.0  ;;  %v114_v49 = vmul.f32 0.2, %v82_v41 }
   0xe   :  { %146 = vst.msk [vmem:[%s355_s3 + $0x28] sm:$0xff] %vm140_vm0, %v129_v44  ;;  %vm99_vm8 = vcmp.ge.f32.partialorder %v83_v42, 0.0  ;;  %v115_v50 = vmul.f32 0.2, %v83_v42  ;;  %v61_v51 = vmul.f32 %v181_v43, %v228_v1  ;;  %v62_v52 = vmul.f32 %v182_v45, %v228_v1 }
   0xf   :  { %v63_v53 = vmul.f32 %v185_v46, %v228_v1  ;;  %v64_v54 = vmul.f32 %v186_v47, %v228_v1  ;;  %v130_v56 = vsel %vm98_vm7, %v82_v41, %v114_v49  ;;  %v189_v58 = vunpack.c.l.bf16 %v200_v48 }
  0x10   :  { %v131_v57 = vsel %vm99_vm8, %v83_v42, %v115_v50  ;;  %v190_v59 = vunpack.c.h.bf16 %v200_v48  ;;  %147 = vst.msk [vmem:[%s355_s3 + $0x30] sm:$0xff] %vm140_vm0, %v130_v56  ;;  %v84_v60 = vadd.f32 %v242_v7, %v61_v51  ;;  %v85_v61 = vadd.f32 %v242_v7, %v62_v52 }
  0x11   :  { %148 = vst.msk [vmem:[%s355_s3 + $0x38] sm:$0xff] %vm140_vm0, %v131_v57  ;;  %v86_v62 = vadd.f32 %v242_v7, %v63_v53  ;;  %v87_v63 = vadd.f32 %v242_v7, %v64_v54  ;;  %v65_v0 = vmul.f32 %v189_v58, %v228_v1  ;;  %v193_v3 = vunpack.c.l.bf16 %v201_v55 }
  0x12   :  { %v66_v2 = vmul.f32 %v190_v59, %v228_v1  ;;  %v194_v4 = vunpack.c.h.bf16 %v201_v55  ;;  %vm100_vm9 = vcmp.ge.f32.partialorder %v84_v60, 0.0  ;;  %v116_v5 = vmul.f32 0.2, %v84_v60 }
  0x13   :  { %vm101_vm10 = vcmp.ge.f32.partialorder %v85_v61, 0.0  ;;  %v117_v6 = vmul.f32 0.2, %v85_v61  ;;  %vm102_vm11 = vcmp.ge.f32.partialorder %v86_v62, 0.0  ;;  %v118_v8 = vmul.f32 0.2, %v86_v62 }
  0x14   :  { %vm103_vm12 = vcmp.ge.f32.partialorder %v87_v63, 0.0  ;;  %v119_v9 = vmul.f32 0.2, %v87_v63  ;;  %v132_v10 = vsel %vm100_vm9, %v84_v60, %v116_v5  ;;  %v88_v12 = vadd.f32 %v242_v7, %v65_v0 }
  0x15   :  { %v133_v11 = vsel %vm101_vm10, %v85_v61, %v117_v6  ;;  %v89_v13 = vadd.f32 %v242_v7, %v66_v2  ;;  %149 = vst.msk [vmem:[%s355_s3 + $0x40] sm:$0xff] %vm140_vm0, %v132_v10  ;;  %v134_v14 = vsel %vm102_vm11, %v86_v62, %v118_v8  ;;  %v67_v16 = vmul.f32 %v193_v3, %v228_v1 }
  0x16   :  { %150 = vst.msk [vmem:[%s355_s3 + $0x48] sm:$0xff] %vm140_vm0, %v133_v11  ;;  %v135_v15 = vsel %vm103_vm12, %v87_v63, %v119_v9  ;;  %v68_v17 = vmul.f32 %v194_v4, %v228_v1  ;;  %151 = vst.msk [vmem:[%s355_s3 + $0x50] sm:$0xff] %vm140_vm0, %v134_v14  ;;  %vm104_vm13 = vcmp.ge.f32.partialorder %v88_v12, 0.0  ;;  %v120_v18 = vmul.f32 0.2, %v88_v12 }
  0x17   :  { %152 = vst.msk [vmem:[%s355_s3 + $0x58] sm:$0xff] %vm140_vm0, %v135_v15  ;;  %vm105_vm14 = vcmp.ge.f32.partialorder %v89_v13, 0.0  ;;  %v121_v19 = vmul.f32 0.2, %v89_v13  ;;  %v90_v20 = vadd.f32 %v242_v7, %v67_v16 }
  0x18   :  { %v91_v21 = vadd.f32 %v242_v7, %v68_v17  ;;  %v136_v22 = vsel %vm104_vm13, %v88_v12, %v120_v18 }
  0x19   :  { %v137_v1 = vsel %vm105_vm14, %v89_v13, %v121_v19  ;;  %153 = vst.msk [vmem:[%s355_s3 + $0x60] sm:$0xff] %vm140_vm0, %v136_v22  ;;  %vm106_vm15 = vcmp.ge.f32.partialorder %v90_v20, 0.0  ;;  %v122_v23 = vmul.f32 0.2, %v90_v20 }
  0x1a   :  { %154 = vst.msk [vmem:[%s355_s3 + $0x68] sm:$0xff] %vm140_vm0, %v137_v1  ;;  %vm107_vm1 = vcmp.ge.f32.partialorder %v91_v21, 0.0  ;;  %v123_v24 = vmul.f32 0.2, %v91_v21 }
  0x1b   :  { %v138_v25 = vsel %vm106_vm15, %v90_v20, %v122_v23 }
  0x1c   :  { %v139_v26 = vsel %vm107_vm1, %v91_v21, %v123_v24  ;;  %155 = vst.msk [vmem:[%s355_s3 + $0x70] sm:$0xff] %vm140_vm0, %v138_v25 }
  0x1d   :  { %156 = vst.msk [vmem:[%s355_s3 + $0x78] sm:$0xff] %vm140_vm0, %v139_v26 }

// kernel: conv_trans_forward.10
= control target key start
LH: loop header
LB: loop body
LE: loop exit
PB: predicated region body
PF: predicated region fallthrough
CT: control target
= control target key end

     0   :  { %s859_s15 = smov 0   ;;  %s985_s0 = inlined_call_operand.vmem [shape: bf16[128,256], index: 0, kind: input, shape index: {}]   ;;  %s986_s1 = inlined_call_operand.vmem [shape: bf16[256,32], index: 1, kind: input, shape index: {}]   ;;  %s987_s2 = inlined_call_operand.vmem [shape: bf16[128,32], index: 2, kind: output, shape index: {0}]   ;;  %s988_s3 = inlined_call_operand.vmem [shape: f32[16,32], index: 3, kind: output, shape index: {1}]   ;;  %s989_s4 = inlined_call_operand.vmem [shape: f32[16,32], index: 4, kind: output, shape index: {2}]  }
   0x1 LB: > { %s865_s16 = sadd.s32 4294967295, %s832_s15   ;;  %p683_p0 = scmp.ge.s32.totalorder %s832_s15, 1  ;;  %s832_s15 = sphi %s859_s15, %s15_s15  }
   0x2   : > { %p169_p1 = scmp.lt.s32.totalorder %s832_s15, 3 }
   0x4   : > { %p170_p2 = pnand %p683_p0, %p169_p1 }
   0x5   : > { %s684_s19 = sshll.u32 (!%p170_p2), %s865_s16, 3  ;;  %p217_p4 = scmp.lt.s32.totalorder (!%p170_p2), %s865_s16, 1 }
   0x6   : > { %173 = sbr.rel (%p170_p2) target bundleno = 279 (0x117), region = 28  ;;  %p205_p3 = scmp.lt.s32.totalorder (!%p170_p2), %s684_s19, 15 }
   0xb   : > { %v798_v0 = vld [vmem:[%s986_s1 + $0x78] sm:$0xff]   ;;  %v800_v2 = vld [vmem:[%s986_s1 + $0x70] sm:$0xff]   ;;  %v802_v4 = vld [vmem:[%s986_s1 + $0x68] sm:$0xff]   ;;  %s991_s19 = smov (!%p205_p3, %s684_s19), 15  ;;  %vm499_vm0 = vcmask 257024   ;;  %vm508_vm1 = vcmask 261120  }
   0xc   : > { %v799_v1 = vld [vmem:[%s986_s1 + $0x38] sm:$0xff]   ;;  %734 = vmatprep.subr.bf16.mxu0 %v798_v0  ;;  %774 = vmatprep.subr.bf16.mxu1 %v798_v0  ;;  %v801_v3 = vld [vmem:[%s986_s1 + $0x30] sm:$0xff]   ;;  %v803_v5 = vld [vmem:[%s986_s1 + $0x28] sm:$0xff]   ;;  %s725_s8 = sshll.u32 %s991_s19, 3  ;;  %s688_s5 = sshll.u32 %s991_s19, 2 }
   0xd   : > { %735 = vmatpush3.bf16.msra.mxu0 %v799_v1  ;;  %782 = vmatpush3.bf16.msra.mxu1 %v799_v1  ;;  %v804_v6 = vld [vmem:[%s986_s1 + $0x60] sm:$0xff]   ;;  %v806_v8 = vld [vmem:[%s986_s1 + $0x58] sm:$0xff]   ;;  %s903_s13 = scalar_lea.vmem %s985_s0, %s725_s8  ;;  %v808_v10 = vld [vmem:[%s986_s1 + $0x50] sm:$0xff]   ;;  %s938_s8 = scalar_lea.vmem %s987_s2, %s688_s5 }
   0xe   : > { %736 = vmatprep.subr.bf16.mxu0 %v800_v2  ;;  %775 = vmatprep.subr.bf16.mxu1 %v800_v2  ;;  %v805_v7 = vld [vmem:[%s986_s1 + $0x20] sm:$0xff]   ;;  %v807_v9 = vld [vmem:[%s986_s1 + $0x18] sm:$0xff]   ;;  %v809_v13 = vld [vmem:[%s986_s1 + $0x10] sm:$0xff]   ;;  %s993_s16 = smov (!%p217_p4, %s865_s16), 1 }
   0xf   : > { %v816_v11 = vld [vmem:[%s903_s13 + $0x4] ss:$8 sps:$4 sm:$0xff]   ;;  %v814_v18 = vld [vmem:[%s903_s13] ss:$8 sps:$4 sm:$0xff]   ;;  %v820_v20 = vld [vmem:[%s903_s13 + $0x14] ss:$8 sps:$4 sm:$0xff]  }
  0x10   : > { %v819_v12 = vld [vmem:[%s903_s13 + $0x24] ss:$8 sps:$4 sm:$0xff]   ;;  %434 = vmatprep.mubr.bf16.mxu0 %v816_v11  ;;  %v817_v19 = vld [vmem:[%s903_s13 + $0x20] ss:$8 sps:$4 sm:$0xff]   ;;  %v823_v21 = vld [vmem:[%s903_s13 + $0x34] ss:$8 sps:$4 sm:$0xff]  }
  0x11   : > { %737 = vmatpush3.bf16.msra.mxu0 %v801_v3  ;;  %783 = vmatpush3.bf16.msra.mxu1 %v801_v3  ;;  %v810_v14 = vld [vmem:[%s986_s1 + $0x48] sm:$0xff]   ;;  %v812_v16 = vld [vmem:[%s986_s1 + $0x40] sm:$0xff]   ;;  %v822_v22 = vld [vmem:[%s903_s13 + $0x10] ss:$8 sps:$4 sm:$0xff]   ;;  %s689_s19 = sshll.u32 %s993_s16, 3 }
  0x12   : > { %738 = vmatprep.subr.bf16.mxu0 %v802_v4  ;;  %776 = vmatprep.subr.bf16.mxu1 %v802_v4  ;;  %v811_v15 = vld [vmem:[%s986_s1 + $0x8] sm:$0xff]   ;;  %v813_v17 = vld [vmem:[%s986_s1] sm:$0xff]   ;;  %v825_v23 = vld [vmem:[%s903_s13 + $0x30] ss:$8 sps:$4 sm:$0xff]   ;;  %s220_s11 = scalar_lea.vmem %s988_s3, %s689_s19  ;;  %s224_s14 = scalar_lea.vmem %s989_s4, %s689_s19 }
  0x13   : > { %450 = vmatprep.mubr.bf16.mxu1 %v819_v12 }
  0x15   : > { %739 = vmatpush3.bf16.msra.mxu0 %v803_v5  ;;  %784 = vmatpush3.bf16.msra.mxu1 %v803_v5 }
  0x16   : > { %740 = vmatprep.subr.bf16.mxu0 %v804_v6  ;;  %777 = vmatprep.subr.bf16.mxu1 %v804_v6 }
  0x19   : > { %741 = vmatpush3.bf16.msra.mxu0 %v805_v7  ;;  %785 = vmatpush3.bf16.msra.mxu1 %v805_v7 }
  0x1a   : > { %742 = vmatprep.subr.bf16.mxu0 %v806_v8  ;;  %778 = vmatprep.subr.bf16.mxu1 %v806_v8 }
  0x1d   : > { %743 = vmatpush3.bf16.msra.mxu0 %v807_v9  ;;  %786 = vmatpush3.bf16.msra.mxu1 %v807_v9 }
  0x1e   : > { %744 = vmatprep.subr.bf16.mxu0 %v808_v10  ;;  %779 = vmatprep.subr.bf16.mxu1 %v808_v10 }
  0x21   : > { %745 = vmatpush3.bf16.msra.mxu0 %v809_v13  ;;  %787 = vmatpush3.bf16.msra.mxu1 %v809_v13 }
  0x22   : > { %746 = vmatprep.subr.bf16.mxu0 %v810_v14  ;;  %780 = vmatprep.subr.bf16.mxu1 %v810_v14 }
  0x25   : > { %747 = vmatpush3.bf16.msra.mxu0 %v811_v15  ;;  %788 = vmatpush3.bf16.msra.mxu1 %v811_v15 }
  0x26   : > { %748 = vmatprep.subr.bf16.mxu0 %v812_v16  ;;  %781 = vmatprep.subr.bf16.mxu1 %v812_v16 }
  0x29   : > { %749 = vmatpush3.bf16.msra.mxu0 %v813_v17  ;;  %789 = vmatpush3.bf16.msra.mxu1 %v813_v17 }
  0x2c   : > { %435 = vmatmul.mubr.bf16.vlgmr.msra.gmra.mxu0 %v814_v18  ;;  %451 = vmatmul.mubr.bf16.vlgmr.msra.gmra.mxu1 %v817_v19 }
  0x2d   : > { %442 = vmatprep.mubr.bf16.mxu0 %v820_v20  ;;  %458 = vmatprep.mubr.bf16.mxu1 %v823_v21 }
  0x34   : > { %443 = vmatmul.mubr.bf16.gmra.mxu0 %v822_v22  ;;  %459 = vmatmul.mubr.bf16.gmra.mxu1 %v825_v23 }
  0xec   : > { %v750_v24 = vpop.f32.mrf.mxu0  ;;  %v762_v25 = vpop.f32.mrf.mxu1 }
  0xee   : > { %v751_v26 = vpop.f32.mrf.mxu0  ;;  %v763_v27 = vpop.f32.mrf.mxu1 }
  0xef   : > { %v752_v28 = vadd.f32 %v751_v26, %v750_v24  ;;  %v764_v29 = vadd.f32 %v763_v27, %v762_v25 }
  0xf0   : > { %v753_v30 = vpop.f32.mrf.mxu0  ;;  %v765_v31 = vpop.f32.mrf.mxu1 }
  0xf1   : > { %v726_v32 = vpack.c.bf16 %v752_v28, %v752_v28  ;;  %v730_v33 = vpack.c.bf16 %v764_v29, %v764_v29  ;;  %v530_v45 = vmul.f32 %v752_v28, %v752_v28  ;;  %v509_v49 = vsel %vm508_vm1, %v752_v28, 0.0 }
  0xf2   : > { %v754_v34 = vpop.f32.mrf.mxu0  ;;  %v766_v35 = vpop.f32.mrf.mxu1  ;;  %v534_v0 = vmul.f32 %v764_v29, %v764_v29  ;;  %v516_v9 = vsel %vm508_vm1, %v764_v29, 0.0 }
  0xf3   : > { %500 = vst.msk [vmem:[%s938_s8] sm:$0xf] %vm499_vm0, %v726_v32  ;;  %504 = vst.msk [vmem:[%s938_s8 + $0x10] sm:$0xf] %vm499_vm0, %v730_v33  ;;  %v755_v36 = vadd.f32 %v754_v34, %v753_v30  ;;  %v767_v37 = vadd.f32 %v766_v35, %v765_v31  ;;  %v538_v60 = vsel %vm508_vm1, %v530_v45, 0.0 }
  0xf4   : > { %v756_v38 = vpop.f32.mrf.mxu0  ;;  %v768_v39 = vpop.f32.mrf.mxu1  ;;  %v545_v14 = vsel %vm508_vm1, %v534_v0, 0.0 }
  0xf5   : > { %v727_v40 = vpack.c.bf16 %v755_v36, %v755_v36  ;;  %v531_v41 = vmul.f32 %v755_v36, %v755_v36  ;;  %v731_v42 = vpack.c.bf16 %v767_v37, %v767_v37  ;;  %v510_v46 = vsel %vm508_vm1, %v755_v36, 0.0 }
  0xf6   : > { %v757_v43 = vpop.f32.mrf.mxu0  ;;  %v769_v44 = vpop.f32.mrf.mxu1  ;;  %v511_v57 = vadd.f32 %v510_v46, %v509_v49  ;;  %v535_v10 = vmul.f32 %v767_v37, %v767_v37  ;;  %v518_v15 = vsel %vm508_vm1, %v767_v37, 0.0 }
  0xf7   : > { %501 = vst.msk [vmem:[%s938_s8 + $0x4] sm:$0xf] %vm499_vm0, %v727_v40  ;;  %505 = vst.msk [vmem:[%s938_s8 + $0x14] sm:$0xf] %vm499_vm0, %v731_v42  ;;  %v758_v47 = vadd.f32 %v757_v43, %v756_v38  ;;  %v770_v48 = vadd.f32 %v769_v44, %v768_v39  ;;  %v539_v50 = vsel %vm508_vm1, %v531_v41, 0.0 }
  0xf8   : > { %v759_v51 = vpop.f32.mrf.mxu0  ;;  %v771_v52 = vpop.f32.mrf.mxu1  ;;  %v540_v1 = vadd.f32 %v539_v50, %v538_v60  ;;  %v547_v19 = vsel %vm508_vm1, %v535_v10, 0.0 }
  0xf9   : > { %v728_v53 = vpack.c.bf16 %v758_v47, %v758_v47  ;;  %v512_v54 = vsel %vm508_vm1, %v758_v47, 0.0  ;;  %v532_v55 = vmul.f32 %v758_v47, %v758_v47  ;;  %v732_v56 = vpack.c.bf16 %v770_v48, %v770_v48 }
  0xfa   : > { %v760_v58 = vpop.f32.mrf.mxu0  ;;  %v772_v59 = vpop.f32.mrf.mxu1  ;;  %v513_v2 = vadd.f32 %v512_v54, %v511_v57  ;;  %v536_v16 = vmul.f32 %v770_v48, %v770_v48  ;;  %v520_v20 = vsel %vm508_vm1, %v770_v48, 0.0 }
  0xfb   : > { %502 = vst.msk [vmem:[%s938_s8 + $0x8] sm:$0xf] %vm499_vm0, %v728_v53  ;;  %v541_v61 = vsel %vm508_vm1, %v532_v55, 0.0  ;;  %506 = vst.msk [vmem:[%s938_s8 + $0x18] sm:$0xf] %vm499_vm0, %v732_v56  ;;  %v761_v62 = vadd.f32 %v760_v58, %v759_v51  ;;  %v773_v63 = vadd.f32 %v772_v59, %v771_v52 }
  0xfc   : > { %v542_v7 = vadd.f32 %v541_v61, %v540_v1  ;;  %v549_v24 = vsel %vm508_vm1, %v536_v16, 0.0 }
  0xfd   : > { %v729_v3 = vpack.c.bf16 %v761_v62, %v761_v62  ;;  %v514_v4 = vsel %vm508_vm1, %v761_v62, 0.0  ;;  %v533_v5 = vmul.f32 %v761_v62, %v761_v62  ;;  %v733_v6 = vpack.c.bf16 %v773_v63, %v773_v63 }
  0xfe   : > { %v515_v8 = vadd.f32 %v514_v4, %v513_v2  ;;  %v537_v21 = vmul.f32 %v773_v63, %v773_v63  ;;  %v522_v25 = vsel %vm508_vm1, %v773_v63, 0.0 }
  0xff   : > { %503 = vst.msk [vmem:[%s938_s8 + $0xc] sm:$0xf] %vm499_vm0, %v729_v3  ;;  %v543_v11 = vsel %vm508_vm1, %v533_v5, 0.0  ;;  %507 = vst.msk [vmem:[%s938_s8 + $0x1c] sm:$0xf] %vm499_vm0, %v733_v6 }
 0x100   : > { %v517_v12 = vadd.f32 %v516_v9, %v515_v8  ;;  %v544_v13 = vadd.f32 %v543_v11, %v542_v7  ;;  %v551_v28 = vsel %vm508_vm1, %v537_v21, 0.0 }
 0x102   : > { %v546_v17 = vadd.f32 %v545_v14, %v544_v13  ;;  %v519_v18 = vadd.f32 %v518_v15, %v517_v12 }
 0x104   : > { %v521_v22 = vadd.f32 %v520_v20, %v519_v18  ;;  %v548_v23 = vadd.f32 %v547_v19, %v546_v17 }
 0x106   : > { %v523_v26 = vadd.f32 %v522_v25, %v521_v22  ;;  %v550_v27 = vadd.f32 %v549_v24, %v548_v23 }
 0x108   : > { %v524_v29 = vrot.slane %v523_v26, 4  ;;  %v552_v30 = vadd.f32 %v551_v28, %v550_v27 }
 0x10a   : > { %v525_v31 = vadd.f32 %v524_v29, %v523_v26  ;;  %v553_v32 = vrot.slane %v552_v30, 4 }
 0x10c   : > { %v526_v33 = vrot.slane %v525_v31, 2  ;;  %v554_v34 = vadd.f32 %v553_v32, %v552_v30 }
 0x10e   : > { %v527_v35 = vadd.f32 %v526_v33, %v525_v31  ;;  %v555_v36 = vrot.slane %v554_v34, 2 }
 0x110   : > { %v528_v37 = vrot.slane %v527_v35, 1  ;;  %v556_v38 = vadd.f32 %v555_v36, %v554_v34 }
 0x112   : > { %v529_v39 = vadd.f32 %v528_v37, %v527_v35  ;;  %v557_v40 = vrot.slane %v556_v38, 1 }
 0x114   : > { %v558_v41 = vadd.f32 %v557_v40, %v556_v38  ;;  %559 = vst.msk [vmem:[%s220_s11] sm:$0xff] %vm508_vm1, %v529_v39 }
 0x116   : > { %560 = vst.msk [vmem:[%s224_s14] sm:$0xff] %vm508_vm1, %v558_v41 }
 0x117 PF: > { %s15_s15 = sadd.s32 1, %s832_s15  }
 0x118   : > { %p12_p5 = scmp.ge.s32.totalorder %s15_s15, 4  }
 0x11a   :  { %14 = sbr.rel (!%p12_p5) target bundleno = 1 (0x1), region = 82 }

</bundles_post_ra>
